<compile_context>
chip_gen: v6e
topology: v6e:2x2x1
jax: 0.10.0
libtpu: 0.0.40
codegen_flags: <defaults>
</compile_context>

<pallas_src>
import functools

import jax
import jax.numpy as jnp
from jax.experimental import pallas as pl
from jax.experimental.pallas import tpu as pltpu


def _explainer_kernel(n_layers, *refs):
    """Fused MLP kernel. refs = (x_ref, wT0, b0, wT1, b1, ..., wT_last, b_last, o_ref).

    Weights arrive pre-transposed as (out, in) bf16; biases as (out, 1) f32.
    Activations are kept lane-dense as (features, tm) with the batch tile on the lane axis.
    """
    x_ref = refs[0]
    o_ref = refs[-1]
    p = refs[1:-1]

    # bf16 downcast only at the MXU feed (x is read in its native dtype).
    x_bf = x_ref[...].astype(jnp.bfloat16)                     # (tm, D)

    h = None
    for i in range(n_layers):
        w_t = p[2 * i][...]                                     # (out_i, in_i) bf16
        b = p[2 * i + 1][...]                                   # (out_i, 1)    f32
        if i == 0:
            # (out0, D) x (tm, D)^T -> (out0, tm): lane-dense result, no explicit x^T.
            z = jax.lax.dot_general(
                w_t, x_bf, (((1,), (1,)), ((), ())),
                preferred_element_type=jnp.float32)
        else:
            # (out_i, in_i) x (in_i, tm) -> (out_i, tm)
            z = jnp.dot(w_t, h, preferred_element_type=jnp.float32)
        z = z + b                                               # bias broadcast over lanes (f32)
        if i < n_layers - 1:
            # ReLU in f32; bf16 only for the next MXU pass.  (Dropout == identity in eval.)
            h = jnp.maximum(z, 0.0).astype(jnp.bfloat16)
        else:
            # Final layer has out_dim == 1 -> (1, tm) lane-dense output row.
            o_ref[...] = jax.nn.sigmoid(z).astype(o_ref.dtype)


def _default_batch_tile(n):
    # The kernel is HBM/grid-overhead bound: pick big lane-aligned tiles (up to 8192 rows)
    # to amortize the ~0.35us fixed per-grid-step cost, but split medium batches into two
    # balanced 128-aligned tiles so both v7x TensorCores get work (grid_n >= 2).
    if n < 256:
        return max(8, -(-n // 8) * 8)               # wrapper collapses this to a single full block
    half = -(-((n + 1) // 2) // 128) * 128          # two balanced, 128-aligned tiles
    return min(8192, half)


def explainer_forward(x, weights, biases, *, tm=None):
    """Run the Explainer MLP with a fused Pallas kernel, tiling over the batch axis.

    x       : (N, embedding_dim) array (any float dtype; consumed as-is, cast in-kernel)
    weights : list of (in_dim, out_dim) arrays (last layer out_dim == 1)
    biases  : list of (1, out_dim) arrays
    returns : (N, 1) float32
    """
    n_layers = len(weights)
    assert n_layers >= 1
    assert weights[-1].shape[-1] == 1, "Explainer's final layer has out_dim == 1"
    N, D = x.shape

    if tm is None:
        tm = _default_batch_tile(N)
    tm = min(int(tm), 8192)
    if tm >= N:
        tm, grid_n = N, 1                           # single full block: no alignment constraints
    else:
        tm = max(128, -(-tm // 128) * 128)          # lane-aligned (1, tm) output blocks
        if tm >= N:
            tm, grid_n = N, 1
        else:
            grid_n = pl.cdiv(N, tm)                 # ragged tail handled by Pallas masking

    # Weights/biases: tiny (KBs) one-time transforms; pre-transpose to (out, in) so every
    # in-kernel matmul produces a lane-dense (out, tm) tile.
    params = []
    vmem_full = pl.BlockSpec(memory_space=pltpu.MemorySpace.VMEM)
    in_specs = [pl.BlockSpec((tm, D), lambda i: (i, 0))]
    for w, b in zip(weights, biases):
        params.append(jnp.transpose(jnp.asarray(w, jnp.bfloat16)))   # (out, in) bf16
        params.append(jnp.asarray(b, jnp.float32).reshape(-1, 1))    # (out, 1)  f32
        in_specs += [vmem_full, vmem_full]

    out_spec = pl.BlockSpec((1, tm), lambda i: (0, i))
    kernel = functools.partial(_explainer_kernel, n_layers)

    out_row = pl.pallas_call(
        kernel,
        out_shape=jax.ShapeDtypeStruct((1, N), jnp.float32),
        grid_spec=pltpu.PrefetchScalarGridSpec(
            num_scalar_prefetch=0,
            grid=(grid_n,),
            in_specs=in_specs,
            out_specs=out_spec,
        ),
        compiler_params=pltpu.CompilerParams(
            dimension_semantics=("parallel",),
        ),
    )(x, *params)

    return out_row.reshape(N, 1)


def init_explainer_params(key, embedding_dim, explanation_embedding_dim, n_explainer_layers):
    """Deterministic init mirroring the PyTorch module's layer shapes."""
    dims_in = [embedding_dim]
    dims_out = [explanation_embedding_dim]
    e = explanation_embedding_dim
    tail = [explanation_embedding_dim // 2 ** (i + 1) for i in range(n_explainer_layers - 2)] + [1]
    for out_dim in tail:
        dims_in.append(e)
        dims_out.append(out_dim)
        e = out_dim

    weights, biases = [], []
    for d_in, d_out in zip(dims_in, dims_out):
        key, kw, kb = jax.random.split(key, 3)
        bound = 1.0 / jnp.sqrt(d_in)
        w = jax.random.uniform(kw, (d_in, d_out), jnp.float32, -bound, bound)
        b = jax.random.uniform(kb, (1, d_out), jnp.float32, -bound, bound)
        weights.append(w)
        biases.append(b)
    return weights, biases


def explainer_ref(x, weights, biases, *, bf16_inputs=True):
    """Pure-JAX reference of the PyTorch forward (eval-mode dropout).

    With bf16_inputs=True it mirrors the kernel's dtype policy (bf16 matmul inputs,
    f32 accumulation / activations); with False it is the plain f32 reference.
    """
    cast = (lambda a: a.astype(jnp.bfloat16)) if bf16_inputs else (lambda a: a)
    h = x
    for w, b in zip(weights[:-1], biases[:-1]):
        z = jnp.dot(cast(h), cast(w), preferred_element_type=jnp.float32) + b.reshape(1, -1)
        h = jnp.maximum(z, 0.0)
    z = jnp.dot(cast(h), cast(weights[-1]), preferred_element_type=jnp.float32)
    z = z + biases[-1].reshape(1, -1)
    return jax.nn.sigmoid(z)


if __name__ == "__main__":
    key = jax.random.PRNGKey(0)

    embedding_dim = 32
    explanation_embedding_dim = 32
    n_explainer_layers = 3  # Linear(32,32) -> Linear(32,16) -> Linear(16,1)

    key, kp = jax.random.split(key)
    weights, biases = init_explainer_params(
        kp, embedding_dim, explanation_embedding_dim, n_explainer_layers
    )

    def check(n):
        nonlocal_key = jax.random.fold_in(key, n)
        x = jax.random.normal(nonlocal_key, (n, embedding_dim), jnp.float32)
        out = jax.block_until_ready(explainer_forward(x, weights, biases))
        ref_bf16 = explainer_ref(x, weights, biases)
        ref_f32 = explainer_ref(x, weights, biases, bf16_inputs=False)
        assert out.shape == (n, 1), (n, out.shape)
        assert jnp.allclose(out, ref_bf16, atol=1e-4, rtol=1e-4), f"bf16-ref mismatch @ N={n}"
        assert jnp.allclose(out, ref_f32, atol=3e-2, rtol=3e-2), f"f32-ref mismatch @ N={n}"

    check(8)      # tiny batch: single full-array block
    check(37)     # non-8-aligned batch: single full-array block, no padding anywhere
    check(300)    # 2-step parallel grid (tm=256) with ragged last tile, no wrapper pad
    check(1024)   # 2-step parallel grid (tm=512), exact tiles

    print("KERNEL_OK")
</pallas_src>

<mosaic_0001>
module attributes {stable_mosaic.version = 11 : i64} {
  func.func @_explainer_kernel(%arg0: i32, %arg1: memref<8x32xf32, #tpu.memory_space<vmem>>, %arg2: memref<32x32xbf16, #tpu.memory_space<vmem>>, %arg3: memref<32x1xf32, #tpu.memory_space<vmem>>, %arg4: memref<16x32xbf16, #tpu.memory_space<vmem>>, %arg5: memref<16x1xf32, #tpu.memory_space<vmem>>, %arg6: memref<1x16xbf16, #tpu.memory_space<vmem>>, %arg7: memref<1x1xf32, #tpu.memory_space<vmem>>, %arg8: memref<1x8xf32, #tpu.memory_space<vmem>>) attributes {dimension_semantics = [#tpu.dimension_semantics<parallel>], iteration_bounds = array<i64: 1>, scalar_prefetch = 0 : i64, scratch_operands = 0 : i64, tpu.core_type = #tpu.core_type<tc>, window_params = [{transform_indices = @transform_0, window_bounds = array<i64: 8, 32>}, {pipeline_mode = #tpu.pipeline_mode<synchronous>, transform_indices = @transform_1, window_bounds = array<i64: 32, 32>}, {pipeline_mode = #tpu.pipeline_mode<synchronous>, transform_indices = @transform_2, window_bounds = array<i64: 32, 1>}, {pipeline_mode = #tpu.pipeline_mode<synchronous>, transform_indices = @transform_3, window_bounds = array<i64: 16, 32>}, {pipeline_mode = #tpu.pipeline_mode<synchronous>, transform_indices = @transform_4, window_bounds = array<i64: 16, 1>}, {pipeline_mode = #tpu.pipeline_mode<synchronous>, transform_indices = @transform_5, window_bounds = array<i64: 1, 16>}, {pipeline_mode = #tpu.pipeline_mode<synchronous>, transform_indices = @transform_6, window_bounds = array<i64: 1, 1>}, {transform_indices = @transform_7, window_bounds = array<i64: 1, 8>}]} {
    %c0 = arith.constant 0 : index
    %c0_0 = arith.constant 0 : index
    %0 = vector.load %arg1[%c0, %c0_0] : memref<8x32xf32, #tpu.memory_space<vmem>>, vector<8x32xf32>
    %1 = arith.truncf %0 : vector<8x32xf32> to vector<8x32xbf16>
    %c0_1 = arith.constant 0 : index
    %c0_2 = arith.constant 0 : index
    %2 = vector.load %arg2[%c0_1, %c0_2] : memref<32x32xbf16, #tpu.memory_space<vmem>>, vector<32x32xbf16>
    %c0_3 = arith.constant 0 : index
    %c0_4 = arith.constant 0 : index
    %3 = vector.load %arg3[%c0_3, %c0_4] : memref<32x1xf32, #tpu.memory_space<vmem>>, vector<32x1xf32>
    %cst = arith.constant dense<0.000000e+00> : vector<32x8xf32>
    %4 = tpu.matmul %2, %1, %cst {dimension_numbers = #tpu.dot_dimension_numbers<[1], [1], [0], [0], [0, 0, 1, 0], [], []>} : vector<32x32xbf16>, vector<8x32xbf16>, vector<32x8xf32> -> vector<32x8xf32>
    %5 = vector.broadcast %3 : vector<32x1xf32> to vector<32x8xf32>
    %6 = arith.addf %4, %5 : vector<32x8xf32>
    %cst_5 = arith.constant 0.000000e+00 : f32
    %7 = vector.broadcast %cst_5 : f32 to vector<32x8xf32>
    %8 = arith.maximumf %6, %7 : vector<32x8xf32>
    %9 = arith.truncf %8 : vector<32x8xf32> to vector<32x8xbf16>
    %c0_6 = arith.constant 0 : index
    %c0_7 = arith.constant 0 : index
    %10 = vector.load %arg4[%c0_6, %c0_7] : memref<16x32xbf16, #tpu.memory_space<vmem>>, vector<16x32xbf16>
    %c0_8 = arith.constant 0 : index
    %c0_9 = arith.constant 0 : index
    %11 = vector.load %arg5[%c0_8, %c0_9] : memref<16x1xf32, #tpu.memory_space<vmem>>, vector<16x1xf32>
    %cst_10 = arith.constant dense<0.000000e+00> : vector<16x8xf32>
    %12 = tpu.matmul %10, %9, %cst_10 {dimension_numbers = #tpu.dot_dimension_numbers<[1], [0], [0], [1], [0, 0, 1, 1], [], []>} : vector<16x32xbf16>, vector<32x8xbf16>, vector<16x8xf32> -> vector<16x8xf32>
    %13 = vector.broadcast %11 : vector<16x1xf32> to vector<16x8xf32>
    %14 = arith.addf %12, %13 : vector<16x8xf32>
    %cst_11 = arith.constant 0.000000e+00 : f32
    %15 = vector.broadcast %cst_11 : f32 to vector<16x8xf32>
    %16 = arith.maximumf %14, %15 : vector<16x8xf32>
    %17 = arith.truncf %16 : vector<16x8xf32> to vector<16x8xbf16>
    %c0_12 = arith.constant 0 : index
    %c0_13 = arith.constant 0 : index
    %18 = vector.load %arg6[%c0_12, %c0_13] : memref<1x16xbf16, #tpu.memory_space<vmem>>, vector<1x16xbf16>
    %c0_14 = arith.constant 0 : index
    %c0_15 = arith.constant 0 : index
    %19 = vector.load %arg7[%c0_14, %c0_15] : memref<1x1xf32, #tpu.memory_space<vmem>>, vector<1x1xf32>
    %cst_16 = arith.constant dense<0.000000e+00> : vector<1x8xf32>
    %20 = tpu.matmul %18, %17, %cst_16 {dimension_numbers = #tpu.dot_dimension_numbers<[1], [0], [0], [1], [0, 0, 1, 1], [], []>} : vector<1x16xbf16>, vector<16x8xbf16>, vector<1x8xf32> -> vector<1x8xf32>
    %21 = vector.broadcast %19 : vector<1x1xf32> to vector<1x8xf32>
    %22 = arith.addf %20, %21 : vector<1x8xf32>
    %23 = arith.negf %22 : vector<1x8xf32>
    %24 = math.exp %23 : vector<1x8xf32>
    %cst_17 = arith.constant 1.000000e+00 : f32
    %25 = vector.broadcast %cst_17 : f32 to vector<1x8xf32>
    %26 = arith.addf %25, %24 : vector<1x8xf32>
    %27 = arith.divf %25, %26 : vector<1x8xf32>
    %c0_18 = arith.constant 0 : index
    %c0_19 = arith.constant 0 : index
    %28 = vector.load %arg8[%c0_18, %c0_19] : memref<1x8xf32, #tpu.memory_space<vmem>>, vector<1x8xf32>
    tpu.vector_store %arg8[%c0_18, %c0_19], %27 {strides = array<i32>} : memref<1x8xf32, #tpu.memory_space<vmem>>, vector<1x8xf32>,
    return
  }
  func.func @transform_0(%arg0: i32) -> (i32, i32) {
    %c0_i32 = arith.constant 0 : i32
    %c0_i32_0 = arith.constant 0 : i32
    return %arg0, %c0_i32 : i32, i32
  }
  func.func @transform_1(%arg0: i32) -> (i32, i32) {
    %c0_i32 = arith.constant 0 : i32
    %c0_i32_0 = arith.constant 0 : i32
    %c0_i32_1 = arith.constant 0 : i32
    return %c0_i32, %c0_i32_0 : i32, i32
  }
  func.func @transform_2(%arg0: i32) -> (i32, i32) {
    %c0_i32 = arith.constant 0 : i32
    %c0_i32_0 = arith.constant 0 : i32
    %c0_i32_1 = arith.constant 0 : i32
    return %c0_i32, %c0_i32_0 : i32, i32
  }
  func.func @transform_3(%arg0: i32) -> (i32, i32) {
    %c0_i32 = arith.constant 0 : i32
    %c0_i32_0 = arith.constant 0 : i32
    %c0_i32_1 = arith.constant 0 : i32
    return %c0_i32, %c0_i32_0 : i32, i32
  }
  func.func @transform_4(%arg0: i32) -> (i32, i32) {
    %c0_i32 = arith.constant 0 : i32
    %c0_i32_0 = arith.constant 0 : i32
    %c0_i32_1 = arith.constant 0 : i32
    return %c0_i32, %c0_i32_0 : i32, i32
  }
  func.func @transform_5(%arg0: i32) -> (i32, i32) {
    %c0_i32 = arith.constant 0 : i32
    %c0_i32_0 = arith.constant 0 : i32
    %c0_i32_1 = arith.constant 0 : i32
    return %c0_i32, %c0_i32_0 : i32, i32
  }
  func.func @transform_6(%arg0: i32) -> (i32, i32) {
    %c0_i32 = arith.constant 0 : i32
    %c0_i32_0 = arith.constant 0 : i32
    %c0_i32_1 = arith.constant 0 : i32
    return %c0_i32, %c0_i32_0 : i32, i32
  }
  func.func @transform_7(%arg0: i32) -> (i32, i32) {
    %c0_i32 = arith.constant 0 : i32
    %c0_i32_0 = arith.constant 0 : i32
    return %c0_i32, %arg0 : i32, i32
  }
}

</mosaic_0001>

<bundles_post_ra>
// kernel: tpu_custom_call.1
= control target key start
LH: loop header
LB: loop body
LE: loop exit
PB: predicated region body
PF: predicated region fallthrough
CT: control target
= control target key end

     0   :  { %s438_s0 = inlined_call_operand.vmem [shape: f32[8,32], index: 0, kind: input, shape index: {}]   ;;  %s439_s1 = inlined_call_operand.vmem [shape: bf16[32,32], index: 1, kind: input, shape index: {}]   ;;  %s440_s2 = inlined_call_operand.vmem [shape: f32[32,1], index: 2, kind: input, shape index: {}]   ;;  %s441_s3 = inlined_call_operand.vmem [shape: bf16[16,32], index: 3, kind: input, shape index: {}]   ;;  %s442_s4 = inlined_call_operand.vmem [shape: f32[16,1], index: 4, kind: input, shape index: {}]   ;;  %s443_s5 = inlined_call_operand.vmem [shape: bf16[1,16], index: 5, kind: input, shape index: {}]   ;;  %s444_s6 = inlined_call_operand.<no memory space> [shape: f32[1,1], index: 6, kind: input, shape index: {}]   ;;  %s445_s7 = inlined_call_operand.hbm [shape: f32[1,8], index: 7, kind: output, shape index: {}]  }
   0x1   :  { %v12_v0 = vstv %s444_s6 }
   0x2   :  { %13 = vst [vmem:[#allocation2] sm:$0x1] %v12_v0 }
   0x3   :  { %v30_v1 = vld [vmem:[%s438_s0] sm:$0xff]  ;;  %vm70_vm0 = vcmask 261120   ;;  %v350_v4 = vmov 0   ;;  %v38_v5 = vld [vmem:[%s440_s2 + $0x10] sm:$0xff]  ;;  %v39_v8 = vld [vmem:[%s440_s2 + $0x18] sm:$0xff] }
   0x4   :  { %v31_v2 = vpack.c.bf16 %v30_v1, %v30_v1  ;;  %v321_v3 = vld [vmem:[%s439_s1] sm:$0xff]   ;;  %319 = vset.pattern.permute.xlu0 %v350_v4  ;;  %320 = vset.pattern.permute.xlu1 %v350_v4 }
   0x5   :  { %296 = vmatprep.mubr.msk.bf16.mxu0 %vm70_vm0, %v321_v3  ;;  %v36_v7 = vld [vmem:[%s440_s2] sm:$0xff]  ;;  %52 = vperm.xlu0 %319, %v38_v5  }
   0x6   :  { %314 = vmatprep.subr.msk.bf16.mxu0 %vm70_vm0, %v31_v2  ;;  %v78_v6 = vsel %vm70_vm0, %v31_v2, 0  ;;  %42 = vperm.xlu1 %320, %v36_v7  }
   0x7   :  { %295 = vmatpush3.bf16.xpose.msra.mxu0 %v78_v6 }
   0x8   :  { %14 = vsyncpa [#allocation4], 0  ;;  %v37_v9 = vld [vmem:[%s440_s2 + $0x8] sm:$0xff]  ;;  %v137_v11 = vld [vmem:[%s442_s4] sm:$0xff]  ;;  %v351_v14 = vmov 0.0   ;;  %vm352_vm1 = vmmov 0   ;;  %v208_v46 = vlaneseq }
   0x9   :  { %v322_v10 = vld [vmem:[%s439_s1 + $0x8] sm:$0xff]   ;;  %57 = vperm.xlu0 %319, %v39_v8   ;;  %v202_v13 = vld [vmem:[#allocation2] sm:$0x1]  ;;  %300 = vmatprep.subr.bf16.mxu1 %v351_v14  ;;  %vm212_vm2 = vcmask 130048   ;;  %vm262_vm3 = vcmask 57344  }
   0xa   :  { %47 = vperm.xlu1 %320, %v37_v9   ;;  %v138_v12 = vld [vmem:[%s442_s4 + $0x8] sm:$0xff]  ;;  %308 = vmatprep.subr.bf16.mxu0 %v351_v14  ;;  %v323_v33 = vld [vmem:[%s441_s3] sm:$0xff]   ;;  %v209_v47 = vshrl.u32 %v208_v46, 7  ;;  %s353_s3 = smov [#allocation3]  }
   0xb   :  { %304 = vmatprep.mubr.msk.bf16.mxu1 %vm352_vm1, %v351_v14  ;;  %v201_v45 = vld [vmem:[%s443_s5] sm:$0x1]  ;;  %s270_s20 = sshll.u32 %s353_s3, 4  ;;  %s271_s20 = int_to_ptr.vmem [resolvable:$true] %s270_s20 }
   0xc   :  { %v210_v48 = vsub.s32 0, %v209_v47  ;;  %s328_s5 = scalar_lea.vmem %s271_s20, 16  ;;  %s332_s21 = scalar_lea.vmem %s271_s20, 32 }
   0xd   :  { %141 = vperm.xlu0 %319, %v137_v11   ;;  %p329_p0 = scmp.ne.s32.totalorder %s271_s20, %s328_s5  ;;  %p333_p1 = scmp.lt.s32.totalorder %s271_s20, %s271_s20 }
   0xe   :  { %297 = vmatmul.mubr.msk.bf16.vlgmr.msra.gmra.mxu0 %vm70_vm0, %v322_v10  ;;  %146 = vperm.xlu1 %320, %v138_v12   ;;  %p334_p2 = scmp.lt.s32.totalorder %s332_s21, %s328_s5 }
   0xf   :  { %310 = vmatprep.mubr.msk.bf16.mxu0 %vm352_vm1, %v351_v14 }
  0x10   :  { %p335_p3 = por %p334_p2, %p333_p1 }
  0x11   :  { %205 = vperm.xlu0 %319, %v202_v13  }
  0x12   :  { %p336_p4 = pnand %p335_p3, %p329_p0 }
  0x80   :  { %v53_v15 = vpop.permute.xlu0 %52 }
  0x81   :  { %v43_v16 = vpop.permute.xlu1 %42 }
  0x84   :  { %v58_v20 = vpop.permute.xlu0 %57 }
  0x85   :  { %v48_v23 = vpop.permute.xlu1 %47 }
  0x88   :  { %v142_v35 = vpop.permute.xlu0 %141 }
  0x89   :  { %v147_v38 = vpop.permute.xlu1 %146 }
  0x8c   :  { %v206_v49 = vpop.permute.xlu0 %205 }
  0x8d   :  { %v211_v50 = vrot.slane %v206_v49, %v210_v48 }
  0xce   :  { %v298_v17 = vpop.f32.mrf.mxu0 }
  0xcf   :  { %v123_v19 = vadd.f32 %v298_v17, %v53_v15 }
  0xd0   :  { %v114_v18 = vpop.f32.mrf.mxu0 }
  0xd1   :  { %v131_v25 = vmax.f32 %v123_v19, 0.0  ;;  %v115_v26 = vadd.f32 %v114_v18, %v43_v16 }
  0xd2   :  { %v299_v21 = vpop.f32.mrf.mxu0 }
  0xd3   :  { %v126_v22 = vadd.f32 %v299_v21, %v58_v20  ;;  %v129_v31 = vmax.f32 %v115_v26, 0.0 }
  0xd4   :  { %v117_v24 = vpop.f32.mrf.mxu0 }
  0xd5   :  { %v132_v27 = vmax.f32 %v126_v22, 0.0  ;;  %v118_v28 = vadd.f32 %v117_v24, %v48_v23 }
  0xd7   :  { %v130_v29 = vmax.f32 %v118_v28, 0.0  ;;  %v134_v30 = vpack.c.bf16 %v132_v27, %v131_v25 }
  0xd9   :  { %301 = vmatpush3.bf16.msra.mxu1 %v134_v30  ;;  %v133_v32 = vpack.c.bf16 %v130_v29, %v129_v31 }
  0xda   :  { %302 = vmatprep.subr.bf16.mxu1 %v351_v14 }
  0xdd   :  { %303 = vmatpush3.bf16.msra.mxu1 %v133_v32 }
  0xe0   :  { %305 = vmatmul.mubr.msk.bf16.vlgmr.msra.gmra.mxu1 %vm70_vm0, %v323_v33 }
 0x1a0   :  { %v191_v34 = vpop.f32.mrf.mxu1 }
 0x1a1   :  { %v192_v37 = vadd.f32 %v191_v34, %v142_v35 }
 0x1a2   :  { %v306_v36 = vpop.f32.mrf.mxu1 }
 0x1a3   :  { %v198_v42 = vmax.f32 %v192_v37, 0.0 }
 0x1a4   :  { %v194_v39 = vpop.f32.mrf.mxu1 }
 0x1a5   :  { %v195_v40 = vadd.f32 %v194_v39, %v147_v38 }
 0x1a6   :  { %v307_v41 = vpop.f32.mrf.mxu1 }
 0x1a7   :  { %v199_v43 = vmax.f32 %v195_v40, 0.0 }
 0x1a9   :  { %v200_v44 = vpack.c.bf16 %v199_v43, %v198_v42 }
 0x1ab   :  { %309 = vmatpush3.bf16.msra.mxu0 %v200_v44 }
 0x1ae   :  { %311 = vmatmul.mubr.msk.bf16.vlgmr.msra.gmra.mxu0 %vm212_vm2, %v201_v45 }
 0x26e   :  { %v250_v51 = vpop.f32.mrf.mxu0 }
 0x26f   :  { %v251_v52 = vadd.f32 %v250_v51, %v211_v50 }
 0x270   :  { %v312_v53 = vpop.f32.mrf.mxu0 }
 0x271   :  { %v285_v54 = vmul.f32 -1.442695, %v251_v52 }
 0x272   :  { %v253_v55 = vpop.f32.mrf.mxu0 }
 0x273   :  { %324 = vpow2.f32 %v285_v54 }
 0x274   :  { %v313_v56 = vpop.f32.mrf.mxu0 }
 0x280   :  { %v325_v57 = vpop.eup %324 }
 0x281   :  { %v259_v58 = vadd.f32 1.0, %v325_v57 }
 0x283   :  { %326 = vrcp.f32 %v259_v58 }
 0x290   :  { %v327_v59 = vpop.eup %326 }
 0x291   :  { %263 = vst.msk [vmem:[#allocation3] sm:$0x1] %vm262_vm3, %v327_v59 }
 0x292   :  { %339 = shalt.err (!%p336_p4)
}
 0x293   :  { %273 = dma.vmem_to_hbm [thread:$0]  %s271_s20, 16, %s445_s7, [#allocation4]  }
 0x294   :  { %348 = dma.done.wait [#allocation4], 16  }
 0x295   :  { %349 = vsyncadd [#allocation4], 4294967280 }
 0x296   :  { %277 = vsyncpa [#allocation4], 1 }

</bundles_post_ra>
